<compile_context>
chip_gen: v7x
topology: tpu7x:2x2x1
jax: 0.10.0
libtpu: 0.0.40
codegen_flags: <defaults>
</compile_context>

<pallas_src>
import functools

import jax
import jax.numpy as jnp
from jax.experimental import pallas as pl
from jax.experimental.pallas import tpu as pltpu

_LANE = 128


def _round_up(x, m):
    return ((x + m - 1) // m) * m


def _pad2(x, rows, cols):
    r, c = x.shape
    return jnp.pad(x, ((0, rows - r), (0, cols - c)))


def _mlp_disc_kernel(x_ref, w1_ref, b1_ref, w2_ref, b2_ref, w3_ref, b3_ref,
                     o_ref, *, out_dim):
    # layer 1: [tm, in_dim] @ [in_dim, h1_pad] -> +bias -> ReLU   (all f32)
    h = jnp.dot(x_ref[...], w1_ref[...], preferred_element_type=jnp.float32)
    h = jnp.maximum(h + b1_ref[...], 0.0)
    # layer 2: [tm, h1_pad] @ [h1_pad, h2_pad] -> +bias -> ReLU
    h = jnp.dot(h, w2_ref[...], preferred_element_type=jnp.float32)
    h = jnp.maximum(h + b2_ref[...], 0.0)
    # output layer: [tm, h2_pad] @ [h2_pad, out_dim] -> +bias   (no padded lanes)
    logits = jnp.dot(h, w3_ref[...], preferred_element_type=jnp.float32)
    logits = logits + b3_ref[...]

    if out_dim == 1:
        # torch.log(torch.sigmoid(x)) == -softplus(-x)
        o_ref[...] = -jnp.logaddexp(0.0, -logits)
    else:
        # log_softmax over the feature axis (logits has exactly out_dim lanes,
        # so no masking is needed).
        m = jnp.max(logits, axis=1, keepdims=True)
        z = logits - m
        lse = jnp.log(jnp.sum(jnp.exp(z), axis=1, keepdims=True))
        o_ref[...] = z - lse


def pad_params(params):
    """Pad only the *hidden* fan-outs to 128 lanes; keep in_dim and out_dim exact.

    Weights are stored [fan_in, fan_out]; biases [1, fan_out].  Each layer's
    fan_in is padded (with zero rows) to match the previous layer's padded
    fan_out, so shapes line up inside the kernel.  Everything stays f32.
    """
    n_layers = len(params) // 2
    out = {}
    prev_pad = params["w1"].shape[0]          # input dim stays unpadded
    for i in range(1, n_layers + 1):
        w = params[f"w{i}"]
        b = params[f"b{i}"]
        fan_out = w.shape[1]
        out_pad = _round_up(fan_out, _LANE) if i < n_layers else fan_out
        out[f"w{i}"] = _pad2(w, prev_pad, out_pad).astype(jnp.float32)
        out[f"b{i}"] = _pad2(b, 1, out_pad).astype(jnp.float32)
        prev_pad = out_pad
    return out


def _choose_tm(batch, cap=2048):
    """Adaptive batch tile: multiple of 8, >=2 blocks when possible, <= cap."""
    half = _round_up(-(-batch // 2), 8)       # ceil(B/2) rounded up to sublane tile
    return max(8, min(cap, half))


def mlp_discriminator_forward(s, padded_params, out_dim, *, tm=None):
    """s: [B, in_dim] f32. padded_params: output of pad_params. Returns [B, out_dim] f32."""
    B, in_dim = s.shape
    assert padded_params["w1"].shape[0] == in_dim
    h1_pad = padded_params["w1"].shape[1]
    h2_pad = padded_params["w2"].shape[1]
    assert padded_params["w2"].shape[0] == h1_pad
    assert padded_params["w3"].shape == (h2_pad, out_dim)
    assert padded_params["b3"].shape == (1, out_dim)

    if tm is None:
        tm = _choose_tm(B)
    n_blocks = pl.cdiv(B, tm)                  # partial edge block handled by Pallas;
                                               # garbage rows are row-independent and
                                               # never stored (no batch reduction).

    kernel = functools.partial(_mlp_disc_kernel, out_dim=out_dim)

    def resident(shape):
        # Weights / biases: same block for every grid step -> stays resident in VMEM.
        return pl.BlockSpec(shape, lambda i: (0, 0))

    return pl.pallas_call(
        kernel,
        out_shape=jax.ShapeDtypeStruct((B, out_dim), jnp.float32),
        grid=(n_blocks,),
        in_specs=[
            pl.BlockSpec((tm, in_dim), lambda i: (i, 0)),   # streamed batch tile, unpadded
            resident((in_dim, h1_pad)),
            resident((1, h1_pad)),
            resident((h1_pad, h2_pad)),
            resident((1, h2_pad)),
            resident((h2_pad, out_dim)),
            resident((1, out_dim)),
        ],
        out_specs=pl.BlockSpec((tm, out_dim), lambda i: (i, 0)),  # narrow store, no post-slice
        compiler_params=pltpu.CompilerParams(
            dimension_semantics=("parallel",),     # shard batch tiles across v7x's 2 TCs
            vmem_limit_bytes=32 * 1024 * 1024,     # headroom, well under v7x 64 MiB VMEM
        ),
    )(s,
      padded_params["w1"], padded_params["b1"],
      padded_params["w2"], padded_params["b2"],
      padded_params["w3"], padded_params["b3"])


def init_params(key, in_dim, hidden_sizes, out_dim):
    """Deterministic init (uniform, LeCun-ish); weights stored [fan_in, fan_out], f32."""
    dims = [in_dim] + list(hidden_sizes) + [out_dim]
    params = {}
    keys = jax.random.split(key, len(dims) - 1)
    for i, (d_in, d_out) in enumerate(zip(dims[:-1], dims[1:]), start=1):
        bound = 1.0 / jnp.sqrt(d_in)
        params[f"w{i}"] = jax.random.uniform(
            keys[i - 1], (d_in, d_out), jnp.float32, -bound, bound)
        params[f"b{i}"] = jnp.zeros((1, d_out), jnp.float32)
    return params


def reference_forward(s, params, out_dim):
    h = jnp.maximum(s @ params["w1"] + params["b1"], 0.0)
    h = jnp.maximum(h @ params["w2"] + params["b2"], 0.0)
    logits = h @ params["w3"] + params["b3"]
    if out_dim == 1:
        return jnp.log(jax.nn.sigmoid(logits))
    return jax.nn.log_softmax(logits, axis=1)


if __name__ == "__main__":
    key = jax.random.PRNGKey(0)
    k_x, k_p, k_p1 = jax.random.split(key, 3)

    batch, in_dim = 8, 16
    hidden_sizes = (32, 32)

    s = jax.random.normal(k_x, (batch, in_dim), jnp.float32)

    # --- multi-class head (log_softmax path) ---
    out_dim = 4
    params = init_params(k_p, in_dim, hidden_sizes, out_dim)
    padded = pad_params(params)
    out = mlp_discriminator_forward(s, padded, out_dim)
    out = jax.block_until_ready(out)
    ref = reference_forward(s, params, out_dim)
    assert out.shape == (batch, out_dim)
    # f32 throughout; tolerance only covers MXU-pass / reduction-order differences.
    assert jnp.allclose(out, ref, atol=1e-2, rtol=1e-2), (
        f"max err {jnp.max(jnp.abs(out - ref))}")

    # --- binary head (log sigmoid path) ---
    out_dim1 = 1
    params1 = init_params(k_p1, in_dim, hidden_sizes, out_dim1)
    padded1 = pad_params(params1)
    out1 = mlp_discriminator_forward(s, padded1, out_dim1)
    out1 = jax.block_until_ready(out1)
    ref1 = reference_forward(s, params1, out_dim1)
    assert out1.shape == (batch, out_dim1)
    assert jnp.allclose(out1, ref1, atol=1e-2, rtol=1e-2), (
        f"max err {jnp.max(jnp.abs(out1 - ref1))}")

    print("KERNEL_OK")
</pallas_src>

<mosaic_0001>
module attributes {stable_mosaic.version = 11 : i64} {
  func.func @_mlp_disc_kernel(%arg0: i32, %arg1: memref<8x16xf32, #tpu.memory_space<vmem>>, %arg2: memref<16x128xf32, #tpu.memory_space<vmem>>, %arg3: memref<1x128xf32, #tpu.memory_space<vmem>>, %arg4: memref<128x128xf32, #tpu.memory_space<vmem>>, %arg5: memref<1x128xf32, #tpu.memory_space<vmem>>, %arg6: memref<128x4xf32, #tpu.memory_space<vmem>>, %arg7: memref<1x4xf32, #tpu.memory_space<vmem>>, %arg8: memref<8x4xf32, #tpu.memory_space<vmem>>) attributes {dimension_semantics = [#tpu.dimension_semantics<parallel>], iteration_bounds = array<i64: 1>, scalar_prefetch = 0 : i64, scratch_operands = 0 : i64, tpu.core_type = #tpu.core_type<tc>, window_params = [{transform_indices = @transform_0, window_bounds = array<i64: 8, 16>}, {pipeline_mode = #tpu.pipeline_mode<synchronous>, transform_indices = @transform_1, window_bounds = array<i64: 16, 128>}, {pipeline_mode = #tpu.pipeline_mode<synchronous>, transform_indices = @transform_2, window_bounds = array<i64: 1, 128>}, {pipeline_mode = #tpu.pipeline_mode<synchronous>, transform_indices = @transform_3, window_bounds = array<i64: 128, 128>}, {pipeline_mode = #tpu.pipeline_mode<synchronous>, transform_indices = @transform_4, window_bounds = array<i64: 1, 128>}, {pipeline_mode = #tpu.pipeline_mode<synchronous>, transform_indices = @transform_5, window_bounds = array<i64: 128, 4>}, {pipeline_mode = #tpu.pipeline_mode<synchronous>, transform_indices = @transform_6, window_bounds = array<i64: 1, 4>}, {transform_indices = @transform_7, window_bounds = array<i64: 8, 4>}]} {
    %c0 = arith.constant 0 : index
    %c0_0 = arith.constant 0 : index
    %0 = vector.load %arg1[%c0, %c0_0] : memref<8x16xf32, #tpu.memory_space<vmem>>, vector<8x16xf32>
    %c0_1 = arith.constant 0 : index
    %c0_2 = arith.constant 0 : index
    %1 = vector.load %arg2[%c0_1, %c0_2] : memref<16x128xf32, #tpu.memory_space<vmem>>, vector<16x128xf32>
    %cst = arith.constant dense<0.000000e+00> : vector<8x128xf32>
    %2 = tpu.matmul %0, %1, %cst {dimension_numbers = #tpu.dot_dimension_numbers<[1], [0], [0], [1], [0, 0, 1, 1], [], []>} : vector<8x16xf32>, vector<16x128xf32>, vector<8x128xf32> -> vector<8x128xf32>
    %c0_3 = arith.constant 0 : index
    %c0_4 = arith.constant 0 : index
    %3 = vector.load %arg3[%c0_3, %c0_4] : memref<1x128xf32, #tpu.memory_space<vmem>>, vector<1x128xf32>
    %4 = vector.broadcast %3 : vector<1x128xf32> to vector<8x128xf32>
    %5 = arith.addf %2, %4 : vector<8x128xf32>
    %cst_5 = arith.constant 0.000000e+00 : f32
    %6 = vector.broadcast %cst_5 : f32 to vector<8x128xf32>
    %7 = arith.maximumf %5, %6 : vector<8x128xf32>
    %c0_6 = arith.constant 0 : index
    %c0_7 = arith.constant 0 : index
    %8 = vector.load %arg4[%c0_6, %c0_7] : memref<128x128xf32, #tpu.memory_space<vmem>>, vector<128x128xf32>
    %cst_8 = arith.constant dense<0.000000e+00> : vector<8x128xf32>
    %9 = tpu.matmul %7, %8, %cst_8 {dimension_numbers = #tpu.dot_dimension_numbers<[1], [0], [0], [1], [0, 0, 1, 1], [], []>} : vector<8x128xf32>, vector<128x128xf32>, vector<8x128xf32> -> vector<8x128xf32>
    %c0_9 = arith.constant 0 : index
    %c0_10 = arith.constant 0 : index
    %10 = vector.load %arg5[%c0_9, %c0_10] : memref<1x128xf32, #tpu.memory_space<vmem>>, vector<1x128xf32>
    %11 = vector.broadcast %10 : vector<1x128xf32> to vector<8x128xf32>
    %12 = arith.addf %9, %11 : vector<8x128xf32>
    %cst_11 = arith.constant 0.000000e+00 : f32
    %13 = vector.broadcast %cst_11 : f32 to vector<8x128xf32>
    %14 = arith.maximumf %12, %13 : vector<8x128xf32>
    %c0_12 = arith.constant 0 : index
    %c0_13 = arith.constant 0 : index
    %15 = vector.load %arg6[%c0_12, %c0_13] : memref<128x4xf32, #tpu.memory_space<vmem>>, vector<128x4xf32>
    %cst_14 = arith.constant dense<0.000000e+00> : vector<8x4xf32>
    %16 = tpu.matmul %14, %15, %cst_14 {dimension_numbers = #tpu.dot_dimension_numbers<[1], [0], [0], [1], [0, 0, 1, 1], [], []>} : vector<8x128xf32>, vector<128x4xf32>, vector<8x4xf32> -> vector<8x4xf32>
    %c0_15 = arith.constant 0 : index
    %c0_16 = arith.constant 0 : index
    %17 = vector.load %arg7[%c0_15, %c0_16] : memref<1x4xf32, #tpu.memory_space<vmem>>, vector<1x4xf32>
    %18 = vector.broadcast %17 : vector<1x4xf32> to vector<8x4xf32>
    %19 = arith.addf %16, %18 : vector<8x4xf32>
    %cst_17 = arith.constant dense<0xFF800000> : vector<8xf32>
    %20 = vector.multi_reduction <maximumf>, %19, %cst_17 [1] : vector<8x4xf32> to vector<8xf32>
    %21 = vector.shape_cast %20 : vector<8xf32> to vector<8x1xf32>
    %22 = vector.broadcast %21 : vector<8x1xf32> to vector<8x4xf32>
    %23 = arith.subf %19, %22 : vector<8x4xf32>
    %24 = math.exp %23 : vector<8x4xf32>
    %cst_18 = arith.constant dense<0.000000e+00> : vector<8xf32>
    %25 = vector.multi_reduction <add>, %24, %cst_18 [1] : vector<8x4xf32> to vector<8xf32>
    %26 = vector.shape_cast %25 : vector<8xf32> to vector<8x1xf32>
    %27 = math.log %26 : vector<8x1xf32>
    %28 = vector.broadcast %27 : vector<8x1xf32> to vector<8x4xf32>
    %29 = arith.subf %23, %28 : vector<8x4xf32>
    %c0_19 = arith.constant 0 : index
    %c0_20 = arith.constant 0 : index
    %30 = vector.load %arg8[%c0_19, %c0_20] : memref<8x4xf32, #tpu.memory_space<vmem>>, vector<8x4xf32>
    tpu.vector_store %arg8[%c0_19, %c0_20], %29 {strides = array<i32>} : memref<8x4xf32, #tpu.memory_space<vmem>>, vector<8x4xf32>,
    return
  }
  func.func @transform_0(%arg0: i32) -> (i32, i32) {
    %c0_i32 = arith.constant 0 : i32
    %c0_i32_0 = arith.constant 0 : i32
    return %arg0, %c0_i32 : i32, i32
  }
  func.func @transform_1(%arg0: i32) -> (i32, i32) {
    %c0_i32 = arith.constant 0 : i32
    %c0_i32_0 = arith.constant 0 : i32
    %c0_i32_1 = arith.constant 0 : i32
    return %c0_i32, %c0_i32_0 : i32, i32
  }
  func.func @transform_2(%arg0: i32) -> (i32, i32) {
    %c0_i32 = arith.constant 0 : i32
    %c0_i32_0 = arith.constant 0 : i32
    %c0_i32_1 = arith.constant 0 : i32
    return %c0_i32, %c0_i32_0 : i32, i32
  }
  func.func @transform_3(%arg0: i32) -> (i32, i32) {
    %c0_i32 = arith.constant 0 : i32
    %c0_i32_0 = arith.constant 0 : i32
    %c0_i32_1 = arith.constant 0 : i32
    return %c0_i32, %c0_i32_0 : i32, i32
  }
  func.func @transform_4(%arg0: i32) -> (i32, i32) {
    %c0_i32 = arith.constant 0 : i32
    %c0_i32_0 = arith.constant 0 : i32
    %c0_i32_1 = arith.constant 0 : i32
    return %c0_i32, %c0_i32_0 : i32, i32
  }
  func.func @transform_5(%arg0: i32) -> (i32, i32) {
    %c0_i32 = arith.constant 0 : i32
    %c0_i32_0 = arith.constant 0 : i32
    %c0_i32_1 = arith.constant 0 : i32
    return %c0_i32, %c0_i32_0 : i32, i32
  }
  func.func @transform_6(%arg0: i32) -> (i32, i32) {
    %c0_i32 = arith.constant 0 : i32
    %c0_i32_0 = arith.constant 0 : i32
    %c0_i32_1 = arith.constant 0 : i32
    return %c0_i32, %c0_i32_0 : i32, i32
  }
  func.func @transform_7(%arg0: i32) -> (i32, i32) {
    %c0_i32 = arith.constant 0 : i32
    %c0_i32_0 = arith.constant 0 : i32
    return %arg0, %c0_i32 : i32, i32
  }
}

</mosaic_0001>

<bundles_post_ra>
// kernel: tpu_custom_call.1
= control target key start
LH: loop header
LB: loop body
LE: loop exit
PB: predicated region body
PF: predicated region fallthrough
CT: control target
= control target key end

     0   :  { %12 = vsyncpa [#allocation3], 0  ;;  %s534_s24 = smov [#allocation2]   ;;  %s726_s0 = inlined_call_operand.vmem [shape: f32[8,16], index: 0, kind: input, shape index: {}]   ;;  %s727_s1 = inlined_call_operand.hbm [shape: f32[16,128], index: 1, kind: input, shape index: {}]   ;;  %s728_s2 = inlined_call_operand.vmem [shape: f32[1,128], index: 2, kind: input, shape index: {}]   ;;  %s729_s3 = inlined_call_operand.vmem [shape: f32[128,128], index: 3, kind: input, shape index: {}]   ;;  %s730_s4 = inlined_call_operand.vmem [shape: f32[1,128], index: 4, kind: input, shape index: {}]   ;;  %s731_s5 = inlined_call_operand.vmem [shape: f32[128,4], index: 5, kind: input, shape index: {}]   ;;  %s732_s6 = inlined_call_operand.vmem [shape: f32[1,4], index: 6, kind: input, shape index: {}]   ;;  %s733_s7 = inlined_call_operand.vmem [shape: f32[8,4], index: 7, kind: output, shape index: {}]  }
   0x1   :  { %s20_s25 = sshll.u32 %s534_s24, 4  ;;  %s510_s28 = scalar_lea.hbm %s727_s1, 256  ;;  %s21_s25 = int_to_ptr.vmem [resolvable:$true] %s20_s25 }
   0x2   :  { %p511_p0 = scmp.ne.s32.totalorder %s727_s1, %s510_s28  ;;  %p514_p1 = scmp.lt.u32.totalorder %s510_s28, %s727_s1 }
   0x4   :  { %p516_p2 = pnand %p514_p1, %p511_p0 }
   0x6   :  { %519 = shalt.err (!%p516_p2)
}
   0x7   :  { %s520_s10 = scalar_lea.vmem %s21_s25, 256  ;;  %p525_p4 = scmp.lt.s32.totalorder %s21_s25, %s21_s25 }
   0x8   :  { %p521_p3 = scmp.ne.s32.totalorder %s21_s25, %s520_s10  ;;  %p526_p5 = scmp.lt.s32.totalorder %s520_s10, %s520_s10 }
   0xa   :  { %p527_p6 = por %p526_p5, %p525_p4 }
   0xc   :  { %p528_p7 = pnand %p527_p6, %p521_p3 }
   0xe   :  { %531 = shalt.err (!%p528_p7)
}
   0xf   :  { %s535_s11 = smov 128   ;;  %s536_s12 = smov 8  }
  0x10   :  { %26 = dma.hbm_to_vmem [thread:$0]  %s727_s1, 256, %s21_s25, [#allocation3], %s535_s11, %s535_s11, %s536_s12  }
  0x11   :  { %532 = dma.done.wait [#allocation3], 256  }
  0x12   :  { %533 = vsyncadd [#allocation3], 4294967040  ;;  %v537_v0 = vmov 0.0|0.0   ;;  %vm538_vm0 = vmmov 0   ;;  %v539_v1 = vmov 0.0   ;;  %v41_v2 = vld [vmem:[#allocation2] sm:$0xff] }
  0x13   :  { %449 = vmatprep.subr.bf16.mxu0 %v537_v0  ;;  %376 = vmatprep.mubr.msk.f32.mxu0 %vm538_vm0, %v539_v1  ;;  %v42_v3 = vld [vmem:[#allocation2 + $0x8] sm:$0xff]  ;;  %v125_v5 = vld [vmem:[%s729_s3] sm:$0xff]  ;;  %v127_v7 = vld [vmem:[%s729_s3 + $0x10] sm:$0xff]  ;;  %vm50_vm1 = vcmask 130048   ;;  %vm312_vm2 = vcmask 31744  }
  0x14   :  { %452 = vmatprep.subr.bf16.mxu1 %v537_v0  ;;  %411 = vmatprep.mubr.msk.f32.mxu1 %vm538_vm0, %v539_v1  ;;  %v450_v4 = vpack.c.bf16 %v42_v3, %v41_v2  ;;  %v126_v6 = vld [vmem:[%s729_s3 + $0x8] sm:$0xff]  ;;  %v128_v9 = vld [vmem:[%s729_s3 + $0x18] sm:$0xff]  ;;  %v40_v10 = vld [vmem:[%s726_s0] sm:$0xff] }
  0x15   :  { %v453_v8 = vpack.c.bf16 %v126_v6, %v125_v5  ;;  %v456_v11 = vpack.c.bf16 %v128_v9, %v127_v7  ;;  %v129_v12 = vld [vmem:[%s729_s3 + $0x20] sm:$0xff]  ;;  %v130_v13 = vld [vmem:[%s729_s3 + $0x28] sm:$0xff]  ;;  %v131_v15 = vld [vmem:[%s729_s3 + $0x30] sm:$0xff] }
  0x16   :  { %451 = vmatpush3.bf16.msra.mxu0 %v450_v4  ;;  %v459_v14 = vpack.c.bf16 %v130_v13, %v129_v12  ;;  %v132_v16 = vld [vmem:[%s729_s3 + $0x38] sm:$0xff]  ;;  %v133_v18 = vld [vmem:[%s729_s3 + $0x40] sm:$0xff]  ;;  %v134_v19 = vld [vmem:[%s729_s3 + $0x48] sm:$0xff] }
  0x17   :  { %454 = vmatpush3.bf16.msra.mxu1 %v453_v8  ;;  %476 = vmatprep.subr.bf16.mxu0 %v537_v0  ;;  %v462_v17 = vpack.c.bf16 %v132_v16, %v131_v15  ;;  %v465_v20 = vpack.c.bf16 %v134_v19, %v133_v18  ;;  %v135_v21 = vld [vmem:[%s729_s3 + $0x50] sm:$0xff]  ;;  %v136_v22 = vld [vmem:[%s729_s3 + $0x58] sm:$0xff]  ;;  %v137_v24 = vld [vmem:[%s729_s3 + $0x60] sm:$0xff] }
  0x18   :  { %455 = vmatprep.subr.bf16.mxu1 %v537_v0  ;;  %v468_v23 = vpack.c.bf16 %v136_v22, %v135_v21  ;;  %v138_v25 = vld [vmem:[%s729_s3 + $0x68] sm:$0xff]  ;;  %v139_v27 = vld [vmem:[%s729_s3 + $0x70] sm:$0xff]  ;;  %v140_v28 = vld [vmem:[%s729_s3 + $0x78] sm:$0xff] }
  0x19   :  { %377 = vmatmul.mubr.msk.f32.vlgmr.msra.gmra.mrb[0].mxu0 %vm50_vm1, %v40_v10  ;;  %v471_v26 = vpack.c.bf16 %v138_v25, %v137_v24  ;;  %v474_v29 = vpack.c.bf16 %v140_v28, %v139_v27  ;;  %v219_v30 = vld [vmem:[%s731_s5] sm:$0xff]  ;;  %v220_v31 = vld [vmem:[%s731_s5 + $0x8] sm:$0xff]  ;;  %v221_v32 = vld [vmem:[%s731_s5 + $0x10] sm:$0xff] }
  0x1a   :  { %446 = vmatprep.mubr.msk.f32.mxu0 %vm538_vm0, %v539_v1  ;;  %v477_v33 = vpack.c.bf16 %v220_v31, %v219_v30  ;;  %v222_v34 = vld [vmem:[%s731_s5 + $0x18] sm:$0xff]  ;;  %v223_v36 = vld [vmem:[%s731_s5 + $0x20] sm:$0xff]  ;;  %v224_v37 = vld [vmem:[%s731_s5 + $0x28] sm:$0xff] }
  0x1b   :  { %457 = vmatpush3.bf16.msra.mxu1 %v456_v11  ;;  %v480_v35 = vpack.c.bf16 %v222_v34, %v221_v32  ;;  %v483_v38 = vpack.c.bf16 %v224_v37, %v223_v36  ;;  %v225_v39 = vld [vmem:[%s731_s5 + $0x30] sm:$0xff]  ;;  %v226_v40 = vld [vmem:[%s731_s5 + $0x38] sm:$0xff]  ;;  %v227_v42 = vld [vmem:[%s731_s5 + $0x40] sm:$0xff] }
  0x1c   :  { %458 = vmatprep.subr.bf16.mxu1 %v537_v0  ;;  %478 = vmatpush3.bf16.msra.mxu0 %v477_v33  ;;  %v486_v41 = vpack.c.bf16 %v226_v40, %v225_v39  ;;  %v228_v43 = vld [vmem:[%s731_s5 + $0x48] sm:$0xff]  ;;  %v229_v45 = vld [vmem:[%s731_s5 + $0x50] sm:$0xff]  ;;  %v230_v46 = vld [vmem:[%s731_s5 + $0x58] sm:$0xff] }
  0x1d   :  { %479 = vmatprep.subr.bf16.mxu0 %v537_v0  ;;  %v489_v44 = vpack.c.bf16 %v228_v43, %v227_v42  ;;  %v492_v47 = vpack.c.bf16 %v230_v46, %v229_v45  ;;  %v231_v48 = vld [vmem:[%s731_s5 + $0x60] sm:$0xff]  ;;  %v232_v49 = vld [vmem:[%s731_s5 + $0x68] sm:$0xff]  ;;  %v233_v56 = vld [vmem:[%s731_s5 + $0x70] sm:$0xff] }
  0x1e   :  { %v495_v50 = vpack.c.bf16 %v232_v49, %v231_v48  ;;  %v331_v51 = vld [vmem:[%s728_s2] ss:$0 sm:$0xff]  ;;  %v234_v57 = vld [vmem:[%s731_s5 + $0x78] sm:$0xff] }
  0x1f   :  { %460 = vmatpush3.bf16.msra.mxu1 %v459_v14  ;;  %v498_v58 = vpack.c.bf16 %v234_v57, %v233_v56  ;;  %v333_v59 = vld [vmem:[%s730_s4] ss:$0 sm:$0xff] }
  0x20   :  { %461 = vmatprep.subr.bf16.mxu1 %v537_v0  ;;  %481 = vmatpush3.bf16.msra.mxu0 %v480_v35 }
  0x21   :  { %482 = vmatprep.subr.bf16.mxu0 %v537_v0 }
  0x23   :  { %463 = vmatpush3.bf16.msra.mxu1 %v462_v17 }
  0x24   :  { %464 = vmatprep.subr.bf16.mxu1 %v537_v0  ;;  %484 = vmatpush3.bf16.msra.mxu0 %v483_v38 }
  0x25   :  { %485 = vmatprep.subr.bf16.mxu0 %v537_v0 }
  0x27   :  { %466 = vmatpush3.bf16.msra.mxu1 %v465_v20 }
  0x28   :  { %467 = vmatprep.subr.bf16.mxu1 %v537_v0  ;;  %487 = vmatpush3.bf16.msra.mxu0 %v486_v41 }
  0x29   :  { %488 = vmatprep.subr.bf16.mxu0 %v537_v0 }
  0x2b   :  { %469 = vmatpush3.bf16.msra.mxu1 %v468_v23 }
  0x2c   :  { %470 = vmatprep.subr.bf16.mxu1 %v537_v0  ;;  %490 = vmatpush3.bf16.msra.mxu0 %v489_v44 }
  0x2d   :  { %491 = vmatprep.subr.bf16.mxu0 %v537_v0 }
  0x2f   :  { %472 = vmatpush3.bf16.msra.mxu1 %v471_v26 }
  0x30   :  { %473 = vmatprep.subr.bf16.mxu1 %v537_v0  ;;  %493 = vmatpush3.bf16.msra.mxu0 %v492_v47 }
  0x31   :  { %494 = vmatprep.subr.bf16.mxu0 %v537_v0 }
  0x33   :  { %475 = vmatpush3.bf16.msra.mxu1 %v474_v29 }
  0x34   :  { %496 = vmatpush3.bf16.msra.mxu0 %v495_v50 }
  0x35   :  { %497 = vmatprep.subr.bf16.mxu0 %v537_v0  ;;  %v334_v0 = vld [vmem:[%s732_s6] ss:$0 sm:$0xff] }
  0x38   :  { %499 = vmatpush3.bf16.msra.mxu0 %v498_v58 }
  0xec   :  { %v120_v52 = vpop.f32.mrb[0].mxu0 }
  0xed   :  { %v121_v53 = vadd.f32 %v331_v51, %v120_v52  ;;  %v378_v54 = vpop.f32.mrb[1].mxu0 }
  0xef   :  { %v124_v55 = vmax.f32 %v121_v53, 0.0 }
  0xf1   :  { %412 = vmatmul.mubr.f32.vlgmr.msra.gmra.mrb[0].mxu1 %v124_v55 }
 0x1c4   :  { %v214_v60 = vpop.f32.mrb[0].mxu1 }
 0x1c5   :  { %v215_v61 = vadd.f32 %v333_v59, %v214_v60  ;;  %v413_v62 = vpop.f32.mrb[1].mxu1 }
 0x1c7   :  { %v218_v63 = vmax.f32 %v215_v61, 0.0 }
 0x1c9   :  { %447 = vmatmul.mubr.f32.vlgmr.msra.gmra.mrb[2].mxu0 %v218_v63 }
 0x29c   :  { %v308_v1 = vpop.f32.mrb[2].mxu0 }
 0x29d   :  { %v309_v2 = vadd.f32 %v334_v0, %v308_v1  ;;  %v448_v3 = vpop.f32.mrb[3].mxu0 }
 0x29f   :  { %v313_v4 = vsel %vm312_vm2, %v309_v2, -inf }
 0x2a0   :  { %314 = vmax.xlane.f32.xlu0 %v313_v4 }
 0x32d   :  { %v315_v5 = vpop.xlane.xlu0 %314 }
 0x32e   :  { %v316_v6 = vsub.f32 %v309_v2, %v315_v5 }
 0x330   :  { %v317_v7 = vmul.f32 1.442695, %v316_v6 }
 0x332   :  { %506 = vpow2.f32 %v317_v7 }
 0x33c   :  { %v507_v8 = vpop.eup %506 }
 0x33d   :  { %v319_v9 = vsel %vm312_vm2, %v507_v8, 0.0 }
 0x33e   :  { %320 = vadd.xlane.f32.xlu0 %v319_v9 }
 0x3cb   :  { %v321_v10 = vpop.xlane.xlu0 %320 }
 0x3cc   :  { %508 = vlog2.f32 %v321_v10 }
 0x3d6   :  { %v509_v11 = vpop.eup %508 }
 0x3d7   :  { %v323_v12 = vmul.f32 0.6931472, %v509_v11 }
 0x3d9   :  { %v324_v13 = vsub.f32 %v316_v6, %v323_v12 }
 0x3db   :  { %325 = vst.msk [vmem:[%s733_s7] sm:$0xff] %vm312_vm2, %v324_v13 }
 0x3dc   :  { %330 = vsyncpa [#allocation3], 1 }

</bundles_post_ra>
